<compile_context>
chip_gen: v7x
topology: tpu7x:2x2x1
jax: 0.10.0
libtpu: 0.0.40
codegen_flags: <defaults>
</compile_context>

<pallas_src>
import jax
import jax.numpy as jnp
from jax import lax
from jax.experimental import pallas as pl
from jax.experimental.pallas import tpu as pltpu


def _round_up(x, m):
    return (x + m - 1) // m * m


def _pick_tile(total, target, align):
    """Largest divisor of `total` that is <= `target` and a multiple of `align`."""
    for cand in range(min(total, target), 0, -1):
        if total % cand == 0 and cand % align == 0:
            return cand
    raise ValueError(f"no {align}-aligned tile divides {total}")


def _vmem_limit(tile_bytes):
    # Double-buffered tiles + 50% headroom; floor 32 MiB, cap below physical
    # VMEM.  With TN<=512 / TB2<=128 the real-shape need stays < 64 MiB (v7x).
    need = 2 * tile_bytes * 3 // 2 + (1 << 20)
    return int(max(32 * 1024 * 1024, min(need, 120 * 1024 * 1024)))


# ---------------------------------------------------------------------------
# Kernel 1: fused projection + CTC heads.   y = C @ [Wp | Wc] + [bp | bc]
# ---------------------------------------------------------------------------
def heads_kernel(c_ref, w_ref, b_ref, p_ref, ctc_ref):
    """c_ref: (1, TB, H) bf16; w_ref: (H, D+Vp) bf16; b_ref: (1, D+Vp) f32.
    p_ref: (1, TB, D) bf16 (proj output, feeds the conv); ctc_ref: (1, TB, Vp) f32."""
    d = p_ref.shape[2]
    y = jnp.dot(c_ref[0], w_ref[...],
                preferred_element_type=jnp.float32) + b_ref[...]
    p_ref[0] = y[:, :d].astype(p_ref.dtype)       # lane slice (multiple of 128)
    ctc_ref[0] = y[:, d:].astype(ctc_ref.dtype)


# ---------------------------------------------------------------------------
# Kernel 2: Conv1d(D, D, kernel_size=3, stride=2, padding=1) on paired P.
#   out[r] = bconv + P[2r-1] @ W0 + P[2r] @ W1 + P[2r+1] @ W2
# where the paired layout is  P2[r] = [ P[2r] | P[2r+1] ]  (free reshape of P).
# ---------------------------------------------------------------------------
def conv_kernel(p2_ref, halo_ref, wconv_ref, bconv_ref, out_ref):
    """p2_ref   : (1, TB2, 2D) bf16  current paired-P time tile
    halo_ref    : (1, 8, 2D)   bf16  8-row block ending at pair row t*TB2 - 1
    wconv_ref   : (3, D, TN)   bf16  conv taps, output-channel slice n
    bconv_ref   : (1, TN)      f32
    out_ref     : (1, TB2, TN) bf16
    """
    t = pl.program_id(2)
    d = wconv_ref.shape[1]
    tb2 = out_ref.shape[1]

    p2 = p2_ref[0]                              # (TB2, 2D) bf16
    p_e = p2[:, :d]                             # P[2r]
    p_o = p2[:, d:]                             # P[2r + 1]

    acc = jnp.dot(p_e, wconv_ref[1], preferred_element_type=jnp.float32)
    acc = acc + jnp.dot(p_o, wconv_ref[2], preferred_element_type=jnp.float32)

    # Tap 0 needs P[2r - 1] = p_o shifted down by one row.  Compute
    # q = p_o @ W0 and shift the f32 *result* on the XLU (pltpu.roll); row 0
    # is patched with the previous tile's last odd row (HBM halo), or zero at
    # the start of the sequence (Conv1d zero padding).
    q = jnp.dot(p_o, wconv_ref[0], preferred_element_type=jnp.float32)
    halo = halo_ref[0]                          # (8, 2D) bf16
    prev = halo[7:8, d:]                        # (1, D)  = P[2*t*TB2 - 1]
    prev_q = jnp.dot(prev, wconv_ref[0], preferred_element_type=jnp.float32)
    prev_q = jnp.where(t > 0, prev_q, jnp.zeros_like(prev_q))
    row0 = lax.broadcasted_iota(jnp.int32, (tb2, 1), 0) == 0
    tap0 = jnp.where(row0, prev_q, pltpu.roll(q, shift=1, axis=0))

    out_ref[0] = (acc + tap0 + bconv_ref[...]).astype(out_ref.dtype)


def audio_encoder_forward(C, params, *, t_block=None, t_block2=None, tn=None):
    """Pallas forward for the post-wav2vec2 heads of AudioEncoder.

    C: (B, T, H) wav2vec2 last_hidden_state.
    Returns (P, ctc_logits) of shapes (B, ceil(T/2), D) bf16 and (B, T, V) f32.
    Tile sizes default to real-shape-friendly values (TB<=256, TB2<=128,
    TN<=512) derived from the extents.
    """
    B, T, H = C.shape
    D = params["wp"].shape[1]
    V = params["wc"].shape[1]

    if T % 2 != 0:
        raise ValueError("T must be even (pad the time axis upstream).")
    if H % 128 != 0 or D % 128 != 0:
        raise ValueError("H and D must be multiples of 128 (lane width).")

    T2 = T // 2
    Vp = _round_up(V, 128)

    TB = t_block or _pick_tile(T, 256, 8)      # heads kernel: raw time steps
    TB2 = t_block2 or _pick_tile(T2, 128, 8)   # conv kernel: pair rows
    TN = tn or _pick_tile(D, 512, 128)         # conv kernel: output channels
    if T % TB or TB % 8 or T2 % TB2 or TB2 % 8 or D % TN or TN % 128:
        raise ValueError("bad tile sizes")

    # ---- parameters -> MXU-friendly layouts (layout plumbing only) ----------
    wp = params["wp"].astype(jnp.bfloat16)                 # (H, D)
    wc = params["wc"].astype(jnp.bfloat16)                 # (H, V)
    bp = params["bp"].astype(jnp.float32)                  # (1, D)
    bc = params["bc"].astype(jnp.float32)                  # (1, V)
    if Vp != V:
        wc = jnp.pad(wc, ((0, 0), (0, Vp - V)))
        bc = jnp.pad(bc, ((0, 0), (0, Vp - V)))
    w_heads = jnp.concatenate([wp, wc], axis=1)            # (H, D + Vp)
    b_heads = jnp.concatenate([bp, bc], axis=1)            # (1, D + Vp)
    wconv = params["wconv"].astype(jnp.bfloat16)           # (3, D, D)
    bconv = params["bconv"].astype(jnp.float32)            # (1, D)
    c = C.astype(jnp.bfloat16)

    # ---- kernel 1: fused proj + CTC heads ------------------------------------
    k1_tile_bytes = (TB * H * 2 + H * (D + Vp) * 2 + (D + Vp) * 4
                     + TB * D * 2 + TB * Vp * 4)
    cost1 = pl.CostEstimate(
        flops=2 * B * T * H * (D + Vp), transcendentals=0,
        bytes_accessed=(B * T * H * 2 + H * (D + Vp) * 2 + (D + Vp) * 4
                        + B * T * D * 2 + B * T * Vp * 4))

    p_flat, ctc_pad = pl.pallas_call(
        heads_kernel,
        out_shape=(jax.ShapeDtypeStruct((B, T, D), jnp.bfloat16),
                   jax.ShapeDtypeStruct((B, T, Vp), jnp.float32)),
        grid_spec=pltpu.PrefetchScalarGridSpec(
            num_scalar_prefetch=0,
            grid=(B, T // TB),
            in_specs=[
                pl.BlockSpec((1, TB, H), lambda b, t: (b, t, 0)),     # C tile
                pl.BlockSpec((H, D + Vp), lambda b, t: (0, 0)),       # fused W
                pl.BlockSpec((1, D + Vp), lambda b, t: (0, 0)),       # fused b
            ],
            out_specs=[
                pl.BlockSpec((1, TB, D), lambda b, t: (b, t, 0)),     # P (bf16)
                pl.BlockSpec((1, TB, Vp), lambda b, t: (b, t, 0)),    # ctc (f32)
            ]),
        compiler_params=pltpu.CompilerParams(
            dimension_semantics=("parallel", "parallel"),
            vmem_limit_bytes=_vmem_limit(k1_tile_bytes)),
        cost_estimate=cost1,
    )(c, w_heads, b_heads)

    # Free row-major reshape: (B, T, D) -> (B, T/2, 2D) pairs consecutive time
    # steps in the lane dimension for the stride-2 conv.
    p2 = p_flat.reshape(B, T2, 2 * D)

    # ---- kernel 2: downsampling Conv1d ---------------------------------------
    n_dout = D // TN
    k2_tile_bytes = (TB2 * 2 * D * 2 + 8 * 2 * D * 2 + 3 * D * TN * 2
                     + TN * 4 + TB2 * TN * 2)
    cost2 = pl.CostEstimate(
        flops=2 * B * T2 * (3 * D) * D, transcendentals=0,
        bytes_accessed=(B * n_dout * T2 * 2 * D * 2 + B * 3 * D * D * 2
                        + B * T2 * D * 2 + D * 4))

    # Halo: 8-pair-row block whose last row is pair index t*TB2 - 1 (the odd
    # P row the first output row of this tile needs).  Clamped to block 0 and
    # masked inside the kernel when t == 0 (zero padding).
    halo_map = lambda b, n, t: (b, jnp.maximum(t * (TB2 // 8) - 1, 0), 0)

    p_out = pl.pallas_call(
        conv_kernel,
        out_shape=jax.ShapeDtypeStruct((B, T2, D), jnp.bfloat16),
        grid_spec=pltpu.PrefetchScalarGridSpec(
            num_scalar_prefetch=0,
            grid=(B, n_dout, T2 // TB2),          # D_out tiles OUTER of time
            in_specs=[
                pl.BlockSpec((1, TB2, 2 * D), lambda b, n, t: (b, t, 0)),
                pl.BlockSpec((1, 8, 2 * D), halo_map),
                pl.BlockSpec((3, D, TN), lambda b, n, t: (0, 0, n)),
                pl.BlockSpec((1, TN), lambda b, n, t: (0, n)),
            ],
            out_specs=pl.BlockSpec((1, TB2, TN), lambda b, n, t: (b, t, n))),
        compiler_params=pltpu.CompilerParams(
            dimension_semantics=("parallel", "parallel", "arbitrary"),
            vmem_limit_bytes=_vmem_limit(k2_tile_bytes)),
        cost_estimate=cost2,
    )(p2, p2, wconv, bconv)

    ctc = ctc_pad[:, :, :V]
    return p_out, ctc


def init_params(key, hidden, llm_dim, vocab):
    ks = jax.random.split(key, 6)
    s = 0.05
    return {
        # nn.Linear(hidden, llm_dim): y = x @ W.T + b -> store W.T as (hidden, llm_dim)
        "wp": (jax.random.normal(ks[0], (hidden, llm_dim), jnp.float32) * s).astype(jnp.bfloat16),
        "bp": jax.random.normal(ks[1], (1, llm_dim), jnp.float32) * s,
        # nn.Linear(hidden, vocab)
        "wc": (jax.random.normal(ks[2], (hidden, vocab), jnp.float32) * s).astype(jnp.bfloat16),
        "bc": jax.random.normal(ks[3], (1, vocab), jnp.float32) * s,
        # nn.Conv1d(llm_dim, llm_dim, 3): torch weight has shape (out, in, k).
        # Stored here as (k, in, out), i.e. wconv[k] == torch_weight[:, :, k].T
        # (== torch_weight.permute(2, 1, 0)[k]) so each tap is a plain
        # (D_in, D_out) matmul operand.  Keep this permutation in mind when
        # porting real checkpoints.
        "wconv": (jax.random.normal(ks[4], (3, llm_dim, llm_dim), jnp.float32) * s).astype(jnp.bfloat16),
        "bconv": jax.random.normal(ks[5], (1, llm_dim), jnp.float32) * s,
    }


def ref_forward(C, params):
    f32 = jnp.float32
    Cb = C.astype(jnp.bfloat16).astype(f32)       # kernel consumes bf16 C
    wp, bp = params["wp"].astype(f32), params["bp"].astype(f32)
    wc, bc = params["wc"].astype(f32), params["bc"].astype(f32)
    wconv, bconv = params["wconv"].astype(f32), params["bconv"].astype(f32)

    ctc = jnp.einsum("bth,hv->btv", Cb, wc) + bc
    P = jnp.einsum("bth,hd->btd", Cb, wp) + bp
    B, T, _ = C.shape
    T_out = (T + 2 - 3) // 2 + 1
    Ppad = jnp.pad(P, ((0, 0), (1, 1), (0, 0)))
    acc = jnp.zeros((B, T_out, P.shape[-1]), f32) + bconv
    for k in range(3):
        acc = acc + jnp.einsum("btd,de->bte",
                               Ppad[:, k:k + 2 * T_out:2, :], wconv[k])
    return acc, ctc


if __name__ == "__main__":
    # Small stand-ins: real wav2vec2-base has H=768; module defaults are
    # llm_dim=4096, ctc_vocab_size=50.  Tiles are forced small so the test
    # exercises multiple time tiles, multiple conv output-channel tiles and
    # the cross-tile halo path.
    B, T, H = 2, 64, 128
    D, V = 256, 50

    key = jax.random.PRNGKey(0)
    k_c, k_p = jax.random.split(key)
    C = jax.random.normal(k_c, (B, T, H), jnp.float32)   # wav2vec last_hidden_state
    params = init_params(k_p, H, D, V)

    P_out, ctc = audio_encoder_forward(C, params, t_block=32, t_block2=8, tn=128)
    jax.block_until_ready((P_out, ctc))

    P_ref, ctc_ref = ref_forward(C, params)
    assert P_out.shape == (B, (T + 2 - 3) // 2 + 1, D)
    assert ctc.shape == (B, T, V)
    P_out32 = P_out.astype(jnp.float32)
    assert jnp.allclose(P_out32, P_ref, rtol=3e-2, atol=3e-2), \
        float(jnp.max(jnp.abs(P_out32 - P_ref)))
    assert jnp.allclose(ctc, ctc_ref, rtol=2e-2, atol=2e-2), \
        float(jnp.max(jnp.abs(ctc - ctc_ref)))

    print("KERNEL_OK")
</pallas_src>

<mosaic_0001>
module attributes {stable_mosaic.version = 11 : i64} {
  func.func @heads_kernel(%arg0: i32, %arg1: i32, %arg2: memref<1x32x128xbf16, #tpu.memory_space<vmem>>, %arg3: memref<128x384xbf16, #tpu.memory_space<vmem>>, %arg4: memref<1x384xf32, #tpu.memory_space<vmem>>, %arg5: memref<1x32x256xbf16, #tpu.memory_space<vmem>>, %arg6: memref<1x32x128xf32, #tpu.memory_space<vmem>>) attributes {dimension_semantics = [#tpu.dimension_semantics<parallel>, #tpu.dimension_semantics<parallel>], iteration_bounds = array<i64: 2, 2>, scalar_prefetch = 0 : i64, scratch_operands = 0 : i64, tpu.core_type = #tpu.core_type<tc>, window_params = [{transform_indices = @transform_0, window_bounds = array<i64: 1, 32, 128>}, {pipeline_mode = #tpu.pipeline_mode<synchronous>, transform_indices = @transform_1, window_bounds = array<i64: 128, 384>}, {pipeline_mode = #tpu.pipeline_mode<synchronous>, transform_indices = @transform_2, window_bounds = array<i64: 1, 384>}, {transform_indices = @transform_3, window_bounds = array<i64: 1, 32, 256>}, {transform_indices = @transform_4, window_bounds = array<i64: 1, 32, 128>}]} {
    %c0 = arith.constant 0 : index
    %c0_0 = arith.constant 0 : index
    %c0_1 = arith.constant 0 : index
    %0 = vector.load %arg2[%c0, %c0_0, %c0_1] : memref<1x32x128xbf16, #tpu.memory_space<vmem>>, vector<1x32x128xbf16>
    %1 = vector.shape_cast %0 : vector<1x32x128xbf16> to vector<32x128xbf16>
    %c0_2 = arith.constant 0 : index
    %c0_3 = arith.constant 0 : index
    %2 = vector.load %arg3[%c0_2, %c0_3] : memref<128x384xbf16, #tpu.memory_space<vmem>>, vector<128x384xbf16>
    %cst = arith.constant dense<0.000000e+00> : vector<32x384xf32>
    %3 = tpu.matmul %1, %2, %cst {dimension_numbers = #tpu.dot_dimension_numbers<[1], [0], [0], [1], [0, 0, 1, 1], [], []>} : vector<32x128xbf16>, vector<128x384xbf16>, vector<32x384xf32> -> vector<32x384xf32>
    %c0_4 = arith.constant 0 : index
    %c0_5 = arith.constant 0 : index
    %4 = vector.load %arg4[%c0_4, %c0_5] : memref<1x384xf32, #tpu.memory_space<vmem>>, vector<1x384xf32>
    %5 = vector.broadcast %4 : vector<1x384xf32> to vector<32x384xf32>
    %6 = arith.addf %3, %5 : vector<32x384xf32>
    %7 = vector.extract_strided_slice %6 {offsets = [0, 0], sizes = [32, 256], strides = [1, 1]} : vector<32x384xf32> to vector<32x256xf32>
    %8 = arith.truncf %7 : vector<32x256xf32> to vector<32x256xbf16>
    %c0_6 = arith.constant 0 : index
    %c0_7 = arith.constant 0 : index
    %c0_8 = arith.constant 0 : index
    %9 = vector.load %arg5[%c0_6, %c0_7, %c0_8] : memref<1x32x256xbf16, #tpu.memory_space<vmem>>, vector<1x32x256xbf16>
    %10 = vector.shape_cast %9 : vector<1x32x256xbf16> to vector<32x256xbf16>
    %11 = vector.shape_cast %8 : vector<32x256xbf16> to vector<1x32x256xbf16>
    tpu.vector_store %arg5[%c0_6, %c0_7, %c0_8], %11 {strides = array<i32>} : memref<1x32x256xbf16, #tpu.memory_space<vmem>>, vector<1x32x256xbf16>,
    %12 = vector.extract_strided_slice %6 {offsets = [0, 256], sizes = [32, 128], strides = [1, 1]} : vector<32x384xf32> to vector<32x128xf32>
    %c0_9 = arith.constant 0 : index
    %c0_10 = arith.constant 0 : index
    %c0_11 = arith.constant 0 : index
    %13 = vector.load %arg6[%c0_9, %c0_10, %c0_11] : memref<1x32x128xf32, #tpu.memory_space<vmem>>, vector<1x32x128xf32>
    %14 = vector.shape_cast %13 : vector<1x32x128xf32> to vector<32x128xf32>
    %15 = vector.shape_cast %12 : vector<32x128xf32> to vector<1x32x128xf32>
    tpu.vector_store %arg6[%c0_9, %c0_10, %c0_11], %15 {strides = array<i32>} : memref<1x32x128xf32, #tpu.memory_space<vmem>>, vector<1x32x128xf32>,
    return
  }
  func.func @transform_0(%arg0: i32, %arg1: i32) -> (i32, i32, i32) {
    %c0_i32 = arith.constant 0 : i32
    %c0_i32_0 = arith.constant 0 : i32
    return %arg0, %arg1, %c0_i32 : i32, i32, i32
  }
  func.func @transform_1(%arg0: i32, %arg1: i32) -> (i32, i32) {
    %c0_i32 = arith.constant 0 : i32
    %c0_i32_0 = arith.constant 0 : i32
    %c0_i32_1 = arith.constant 0 : i32
    return %c0_i32, %c0_i32_0 : i32, i32
  }
  func.func @transform_2(%arg0: i32, %arg1: i32) -> (i32, i32) {
    %c0_i32 = arith.constant 0 : i32
    %c0_i32_0 = arith.constant 0 : i32
    %c0_i32_1 = arith.constant 0 : i32
    return %c0_i32, %c0_i32_0 : i32, i32
  }
  func.func @transform_3(%arg0: i32, %arg1: i32) -> (i32, i32, i32) {
    %c0_i32 = arith.constant 0 : i32
    %c0_i32_0 = arith.constant 0 : i32
    return %arg0, %arg1, %c0_i32 : i32, i32, i32
  }
  func.func @transform_4(%arg0: i32, %arg1: i32) -> (i32, i32, i32) {
    %c0_i32 = arith.constant 0 : i32
    %c0_i32_0 = arith.constant 0 : i32
    return %arg0, %arg1, %c0_i32 : i32, i32, i32
  }
}

</mosaic_0001>

<bundles_post_ra>
// kernel: tpu_custom_call.1
= control target key start
LH: loop header
LB: loop body
LE: loop exit
PB: predicated region body
PF: predicated region fallthrough
CT: control target
= control target key end

     0   :  { %s1544_s0 = inlined_call_operand.hbm [shape: bf16[2,64,128], index: 0, kind: input, shape index: {}]   ;;  %s1545_s1 = inlined_call_operand.hbm [shape: bf16[128,384], index: 1, kind: input, shape index: {}]   ;;  %s1546_s2 = inlined_call_operand.vmem [shape: f32[1,384], index: 2, kind: input, shape index: {}]   ;;  %s1547_s3 = inlined_call_operand.hbm [shape: bf16[2,64,256], index: 3, kind: output, shape index: {0}]   ;;  %s1548_s4 = inlined_call_operand.hbm [shape: f32[2,64,128], index: 4, kind: output, shape index: {1}]  }
   0x1   :  { %1558 = sst [smem:[#allocation19_spill]] %s1545_s1 }
   0x2   :  { %10 = vsyncpa [#allocation3], 0 }
   0x3   :  { %12 = vsyncpa [#allocation3 + $0x1], 0 }
   0x4   :  { %13 = vsyncpa [#allocation6], 0 }
   0x5   :  { %14 = vsyncpa [#allocation4], 0 }
   0x6   :  { %16 = vsyncpa [#allocation4 + $0x1], 0 }
   0x7   :  { %17 = vsyncpa [#allocation9], 0 }
   0x8   :  { %19 = vsyncpa [#allocation9 + $0x1], 0  ;;  %s1223_s15 = smov 0   ;;  %s1225_s16 = smov 0  }
   0x9   :  { %s1227_s17 = smov 0   ;;  %s1229_s18 = smov 0  }
   0xa   :  { %s1231_s19 = smov 0   ;;  %s1233_s20 = smov 0  }
   0xb   :  { %s1235_s21 = smov 0   ;;  %s1237_s22 = smov 0  }
   0xc LB: > { %1559 = sst [smem:[#allocation14_spill]] %s1157_s15  ;;  %s768_s23 = sadd.s32 4294967295, %s1185_s22   ;;  %s1185_s22 = sphi %s1237_s22, %s25_s22   ;;  %s1181_s21 = sphi %s1235_s21, %s1588_s21   ;;  %s1177_s20 = sphi %s1233_s20, %s1582_s20   ;;  %s1173_s19 = sphi %s1231_s19, %s1587_s19   ;;  %s1169_s18 = sphi %s1229_s18, %s1581_s18   ;;  %s1165_s17 = sphi %s1227_s17, %s1586_s17   ;;  %s1161_s16 = sphi %s1225_s16, %s1585_s16   ;;  %s1157_s15 = sphi %s1223_s15, %s1584_s15  }
   0xd   : > { %1560 = sst [smem:[#allocation15_spill]] %s1177_s20  ;;  %s769_s24 = sadd.s32 4294967294, %s1185_s22  }
   0xe   : > { %p59_p0 = scmp.ne.s32.totalorder %s1161_s16, %s1157_s15  ;;  %p1267_p1 = scmp.eq.s32.totalorder %s768_s23, 0 }
   0xf   : > { %p1271_p2 = scmp.eq.s32.totalorder %s768_s23, 3  ;;  %p133_p3 = scmp.eq.s32.totalorder %s769_s24, 3 }
  0x10   : > { %s1561_s25 = scalar_select %p1267_p1, 1, 0 }
  0x11   : > { %s1562_s26 = scalar_select %p1271_p2, 1, 0 }
  0x12   : > { %p1277_p4 = por %p1267_p1, %p59_p0  ;;  %p770_p5 = scmp.ge.s32.totalorder %s1185_s22, 1 }
  0x13   : > { %p1282_p6 = por %p133_p3, %p59_p0  ;;  %p168_p7 = scmp.lt.s32.totalorder %s1185_s22, 5 }
  0x14   : > { %s1563_s27 = scalar_select %p1277_p4, 1, 0 }
  0x15   : > { %s1564_s28 = scalar_select %p1282_p6, 1, 0 }
  0x16   : > { %p1287_p8 = pnand %p770_p5, %p168_p7  ;;  %s1187_s30 = smov [#allocation5]  }
  0x17   : > { %1565 = sst [smem:[#allocation16_spill]] %s1564_s28  ;;  %s180_s5 = sshll.u32 %s1187_s30, 4  ;;  %s181_s5 = int_to_ptr.vmem [resolvable:$true] %s180_s5 }
  0x18   : > { %s1566_s29 = scalar_select %p1287_p8, 1, 0 }
  0x19   : > { %p868_p9 = pneg %p1287_p8  ;;  %s1568_s1 = sld [smem:[#allocation19_spill]] }
  0x1b   : > { %p1295_p10 = pnand %p868_p9, %p1267_p1 }
  0x1d   : > { %p995_p12 = pneg %p1295_p10 }
  0x1f   : > { %s993_s9 = scalar_lea.hbm %s1568_s1, 3072 }
  0x20   : > { %p994_p11 = scmp.ne.s32.totalorder %s1568_s1, %s993_s9  ;;  %p1000_p3 = scmp.lt.u32.totalorder %s993_s9, %s1568_s1 }
  0x22   : > { %p996_p13 = pnand %p995_p12, %p994_p11 }
  0x24   : > { %p997_p0 = pneg %p996_p13 }
  0x26   : > { %p1002_p5 = pnand %p1000_p3, %p997_p0 }
  0x28   : > { %1005 = shalt.err (!%p1002_p5)
}
  0x29   : > { %s1006_s14 = scalar_lea.vmem %s181_s5, 3072  ;;  %p1014_p1 = scmp.lt.s32.totalorder %s181_s5, %s181_s5 }
  0x2a   : > { %p1007_p7 = scmp.ne.s32.totalorder %s181_s5, %s1006_s14  ;;  %p1015_p4 = scmp.lt.s32.totalorder %s1006_s14, %s1006_s14 }
  0x2c   : > { %p1009_p9 = pnand %p1007_p7, %p995_p12  ;;  %p1016_p8 = por %p1015_p4, %p1014_p1 }
  0x2e   : > { %p1010_p6 = pneg %p1009_p9 }
  0x30   : > { %p1017_p2 = pnand %p1016_p8, %p1010_p6 }
  0x32   : > { %1020 = shalt.err (!%p1017_p2)
}
  0x33   : > { %s1188_s23 = smov 192   ;;  %s1189_s24 = smov 12  }
  0x34   : > { %871 = dma.hbm_to_vmem [thread:$0]  (!%p1295_p10), %s1568_s1, 3072, %s181_s5, [#allocation6], %s1188_s23, %s1188_s23, %s1189_s24  }
  0x35   : > { %s34_s8 = sadd.s32 1, %s1177_s20  ;;  %s37_s9 = sadd.s32 1, %s1181_s21 }
  0x36   : > { %p35_p1 = scmp.ge.s32.totalorder %s34_s8, 2  ;;  %s46_s10 = sadd.s32 1, %s1165_s17 }
  0x37   : > { %p53_p2 = scmp.ne.s32.totalorder %s1165_s17, %s1161_s16  ;;  %p54_p4 = scmp.eq.s32.totalorder %s1185_s22, 0 }
  0x38   : > { %s1590_s8 = smov (%p35_p1, %s34_s8), 0  ;;  %s1592_s9 = smov (!%p35_p1, %s37_s9), %s1181_s21 }
  0x39   : > { %1569 = sst [smem:[#allocation17_spill]] %s1590_s8  ;;  %s42_s11 = ssub.s32 %s1177_s20, %s1590_s8 }
  0x3a   : > { %p39_p6 = scmp.ge.s32.totalorder %s1592_s9, 2  ;;  %p1570_p8 = scmp.ne.s32.totalorder %s1562_s26, 0 }
  0x3b   : > { %p1332_p10 = por %p54_p4, %p53_p2  ;;  %p884_p12 = scmp.lt.s32.totalorder %s1185_s22, 4 }
  0x3c   : > { %p1328_p11 = por %p1570_p8, %p53_p2  ;;  %s1594_s9 = smov (%p39_p6, %s1592_s9), 0 }
  0x3d   : > { %1573 = sst [smem:[#allocation18_spill]] %s1594_s9  ;;  %s197_s12 = sand.u32 1, %s1165_s17  }
  0x3e   : > { %s774_s13 = sshll.u32 %s1177_s20, 2  ;;  %s41_s14 = ssub.s32 %s1181_s21, %s1594_s9 }
  0x3f   : > { %s43_s23 = sor.u32 %s42_s11, %s41_s14  ;;  %s773_s24 = sshll.u32 %s197_s12, 4 }
  0x40   : > { %p44_p13 = scmp.eq.s32.totalorder %s43_s23, 0  ;;  %s775_s26 = sshll.u32 %s1181_s21, 3 }
  0x41   : > { %s201_s30 = scalar_lea.vmem [#allocation2], %s773_s24  ;;  %s207_s8 = sadd.s32 %s775_s26, %s774_s13 }
  0x42   : > { %s210_s7 = sshll.u32 %s201_s30, 4  ;;  %s776_s28 = sshll.u32 %s207_s8, 6  ;;  %s1347_s7 = int_to_ptr.vmem [resolvable:$true] %s210_s7 }
  0x43   : > { %s1345_s1 = scalar_select %p44_p13, %s1165_s17, %s46_s10  }
  0x44   : > { %p1353_p0 = pnand %p884_p12, %p1332_p10  ;;  %s1360_s11 = scalar_lea.hbm %s1544_s0, %s776_s28 }
  0x45   : > { %s1362_s10 = scalar_lea.sflag [#allocation3], %s197_s12  ;;  %s1021_s8 = scalar_lea.hbm %s1360_s11, 256 }
  0x46   : > { %p1022_p3 = scmp.ne.s32.totalorder %s1360_s11, %s1021_s8  ;;  %p1023_p5 = pneg %p1353_p0 }
  0x47   : > { %s1026_s9 = scalar_lea.hbm %s1544_s0, 1024  ;;  %p1027_p1 = scmp.lt.u32.totalorder %s1360_s11, %s1544_s0 }
  0x48   : > { %p1024_p7 = pnand %p1023_p5, %p1022_p3  ;;  %p1028_p2 = scmp.lt.u32.totalorder %s1026_s9, %s1021_s8 }
  0x49   : > { %p1030_p6 = scmp.lt.u32.totalorder %s1021_s8, %s1360_s11 }
  0x4a   : > { %p1025_p9 = pneg %p1024_p7  ;;  %p1029_p4 = por %p1028_p2, %p1027_p1 }
  0x4c   : > { %p1031_p8 = por %p1030_p6, %p1029_p4 }
  0x4e   : > { %p1032_p10 = pnand %p1031_p8, %p1025_p9 }
  0x50   : > { %1035 = shalt.err (!%p1032_p10)
}
  0x51   : > { %s1036_s12 = scalar_lea.vmem %s1347_s7, 256  ;;  %s1190_s14 = smov [#allocation2]  }
  0x52   : > { %p1037_p12 = scmp.ne.s32.totalorder %s1347_s7, %s1036_s12  ;;  %s1041_s23 = sshll.u32 %s1190_s14, 4  ;;  %s1042_s23 = int_to_ptr.vmem [resolvable:$false] %s1041_s23 }
  0x53   : > { %s1043_s24 = scalar_lea.vmem %s1042_s23, 512  ;;  %p1044_p7 = scmp.lt.s32.totalorder %s1347_s7, %s1042_s23 }
  0x54   : > { %p1039_p13 = pnand %p1037_p12, %p1023_p5  ;;  %p1045_p1 = scmp.lt.s32.totalorder %s1043_s24, %s1036_s12 }
  0x56   : > { %p1040_p3 = pneg %p1039_p13  ;;  %p1046_p2 = por %p1045_p1, %p1044_p7 }
  0x58   : > { %p1047_p4 = pnand %p1046_p2, %p1040_p3 }
  0x5a   : > { %1050 = shalt.err (!%p1047_p4)
}
  0x5b   : > { %s1191_s26 = smov 64   ;;  %s1192_s30 = smov 4  }
  0x5c   : > { %875 = dma.hbm_to_vmem [thread:$0]  (!%p1353_p0), %s1360_s11, 256, %s1347_s7, %s1362_s10, %s1191_s26, %s1191_s26, %s1192_s30  }
  0x5d   : > { %p1575_p5 = scmp.ne.s32.totalorder %s1566_s29, 0 }
  0x5e   : > { %s1393_s8 = sand.u32 (!%p1575_p5), 1, %s1161_s16   ;;  %p1576_p9 = scmp.ne.s32.totalorder (!%p1575_p5), %s1563_s27, 0 }
  0x5f   : > { %222 = sbr.rel (%p1575_p5) target bundleno = 399 (0x18f), region = 32  ;;  %s778_s5 = sshll.u32 (!%p1575_p5), %s1393_s8, 4 }
  0x60   : > { %s225_s20 = scalar_lea.sflag (!%p1575_p5), [#allocation3], %s1393_s8  ;;  %s1397_s9 = scalar_lea.vmem (!%p1575_p5), [#allocation2], %s778_s5 }
  0x66   : > { %1140 = dma.done.wait (%p1576_p9), %s225_s20, 256  }
  0x67   : > { %1142 = vsyncadd (%p1576_p9), %s225_s20, 4294967040  ;;  %p1577_p0 = scmp.ne.s32.totalorder %s1561_s25, 0 }
  0x69   : > { %1144 = dma.done.wait (%p1577_p0), [#allocation6], 3072  }
  0x6a   : > { %1146 = vsyncadd (%p1577_p0), [#allocation6], 4294964224  ;;  %v1193_v0 = vmov 0   ;;  %v959_v1 = vld [vmem:[#allocation5 + $0x4] ss:$12 sps:$4 sm:$0xff]   ;;  %v992_v26 = vld [vmem:[%s1397_s9 + $0x8] sm:$0xff]   ;;  %v304_v27 = vlaneseq }
  0x6b   : > { %491 = vmatprep.mubr.bf16.mxu0 %v1193_v0  ;;  %v961_v2 = vld [vmem:[#allocation5] ss:$12 sps:$4 sm:$0xff]   ;;  %459 = vmatprep.subr.bf16.mxu0 %v959_v1  ;;  %v962_v3 = vld [vmem:[#allocation5 + $0x1c] ss:$12 sps:$4 sm:$0xff]   ;;  %v964_v4 = vld [vmem:[#allocation5 + $0x18] ss:$12 sps:$4 sm:$0xff]  }
  0x6c   : > { %460 = vmatpush1.bf16.msra.mxu0 %v961_v2  ;;  %v965_v5 = vld [vmem:[#allocation5 + $0x8] ss:$12 sps:$4 sm:$0xff]   ;;  %v969_v7 = vld [vmem:[#allocation5 + $0x20] ss:$12 sps:$4 sm:$0xff]   ;;  %v968_v8 = vld [vmem:[#allocation5 + $0x30] ss:$12 sps:$4 sm:$0xff]  }
  0x6d   : > { %461 = vmatprep.subr.bf16.mxu0 %v962_v3  ;;  %v966_v6 = vld [vmem:[#allocation5 + $0x34] ss:$12 sps:$4 sm:$0xff]   ;;  %838 = vmatprep.subr.bf16.mxu1 %v965_v5  ;;  %v970_v9 = vld [vmem:[#allocation5 + $0x4c] ss:$12 sps:$4 sm:$0xff]   ;;  %v977_v12 = vld [vmem:[#allocation5 + $0x50] ss:$12 sps:$4 sm:$0xff]  }
  0x6e   : > { %839 = vmatpush3.bf16.msra.mxu1 %v965_v5  ;;  %v973_v10 = vld [vmem:[#allocation5 + $0x38] ss:$12 sps:$4 sm:$0xff]   ;;  %v972_v11 = vld [vmem:[#allocation5 + $0x48] ss:$12 sps:$4 sm:$0xff]   ;;  %v976_v14 = vld [vmem:[#allocation5 + $0x60] ss:$12 sps:$4 sm:$0xff]  }
  0x6f   : > { %840 = vmatprep.subr.bf16.mxu1 %v969_v7  ;;  %v974_v13 = vld [vmem:[#allocation5 + $0x64] ss:$12 sps:$4 sm:$0xff]   ;;  %v981_v15 = vld [vmem:[#allocation5 + $0x68] ss:$12 sps:$4 sm:$0xff]   ;;  %v985_v19 = vld [vmem:[#allocation5 + $0x80] ss:$12 sps:$4 sm:$0xff]  }
  0x70   : > { %462 = vmatpush1.bf16.msra.mxu0 %v964_v4  ;;  %v978_v16 = vld [vmem:[#allocation5 + $0x7c] ss:$12 sps:$4 sm:$0xff]   ;;  %v980_v17 = vld [vmem:[#allocation5 + $0x78] ss:$12 sps:$4 sm:$0xff]   ;;  %v982_v20 = vld [vmem:[#allocation5 + $0x94] ss:$12 sps:$4 sm:$0xff]  }
  0x71   : > { %463 = vmatprep.subr.bf16.mxu0 %v966_v6  ;;  %v990_v18 = vld [vmem:[%s1397_s9] sm:$0xff]   ;;  %v986_v23 = vld [vmem:[#allocation5 + $0xac] ss:$12 sps:$4 sm:$0xff]   ;;  %v305_v28 = vshrl.u32 %v304_v27, 7  ;;  %s818_s27 = sshll.u32 %s1169_s18, 2  ;;  %s819_s29 = sshll.u32 %s1173_s19, 3 }
  0x72   : > { %841 = vmatpush3.bf16.msra.mxu1 %v969_v7  ;;  %854 = vmatprep.mubr.bf16.mxu1 %v990_v18  ;;  %v984_v21 = vld [vmem:[#allocation5 + $0x90] ss:$12 sps:$4 sm:$0xff]   ;;  %v989_v22 = vld [vmem:[#allocation5 + $0x98] ss:$12 sps:$4 sm:$0xff]   ;;  %v988_v24 = vld [vmem:[#allocation5 + $0xa8] ss:$12 sps:$4 sm:$0xff]   ;;  %s630_s28 = sadd.s32 %s819_s29, %s818_s27 }
  0x73   : > { %842 = vmatprep.subr.bf16.mxu1 %v973_v10  ;;  %v991_v25 = vld [vmem:[#allocation5 + $0xb0] ss:$12 sps:$4 sm:$0xff]   ;;  %v306_v29 = vsub.s32 0, %v305_v28  ;;  %v302_v30 = vld [vmem:[%s1546_s2] sm:$0x7]  ;;  %v310_v31 = vsub.s32 1, %v305_v28 }
  0x74   : > { %464 = vmatpush1.bf16.msra.mxu0 %v968_v8  ;;  %v314_v32 = vsub.s32 2, %v305_v28  ;;  %s780_s7 = sshll.u32 %s1393_s8, 5  ;;  %s820_s13 = sshll.u32 %s630_s28, 7 }
  0x75   : > { %465 = vmatprep.subr.bf16.mxu0 %v970_v9  ;;  %v1412_v33 = vrot.slane %v302_v30, %v306_v29  ;;  %v1414_v34 = vrot.slane %v302_v30, %v310_v31  ;;  %s1420_s11 = scalar_lea.vmem [#allocation8], %s780_s7  ;;  %s827_s12 = sshll.u32 %s1169_s18, 3 }
  0x76   : > { %843 = vmatpush3.bf16.msra.mxu1 %v973_v10  ;;  %v315_v36 = vrot.slane %v302_v30, %v314_v32  ;;  %s633_s10 = sshll.u32 %s1420_s11, 4  ;;  %s816_s14 = sshll.u32 %s1173_s19, 4  ;;  %s1426_s10 = int_to_ptr.vmem [resolvable:$true] %s633_s10 }
  0x77   : > { %844 = vmatprep.subr.bf16.mxu1 %v977_v12  ;;  %s1430_s23 = scalar_lea.vmem [#allocation7], %s780_s7  ;;  %s1438_s19 = scalar_lea.hbm %s1548_s4, %s820_s13 }
  0x78   : > { %466 = vmatpush1.bf16.msra.mxu0 %v972_v11  ;;  %s1442_s26 = sadd.s32 %s827_s12, %s816_s14  ;;  %s615_s30 = sshll.u32 %s1430_s23, 4  ;;  %s1480_s30 = int_to_ptr.vmem [resolvable:$true] %s615_s30 }
  0x79   : > { %467 = vmatprep.subr.bf16.mxu0 %v974_v13  ;;  %s599_s5 = scalar_lea.sflag [#allocation9], %s1393_s8  ;;  %s1051_s20 = scalar_lea.vmem %s1426_s10, 512 }
  0x7a   : > { %845 = vmatpush3.bf16.msra.mxu1 %v977_v12  ;;  %p1052_p6 = scmp.ne.s32.totalorder %s1426_s10, %s1051_s20  ;;  %s1194_s9 = smov [#allocation8]  }
  0x7b   : > { %846 = vmatprep.subr.bf16.mxu1 %v981_v15  ;;  %s1055_s15 = sshll.u32 %s1194_s9, 4  ;;  %s1056_s15 = int_to_ptr.vmem [resolvable:$false] %s1055_s15 }
  0x7c   : > { %468 = vmatpush1.bf16.msra.mxu0 %v976_v14  ;;  %p1053_p8 = pnand %p1052_p6, %p1328_p11  ;;  %s1057_s25 = scalar_lea.vmem %s1056_s15, 1024 }
  0x7d   : > { %469 = vmatprep.subr.bf16.mxu0 %v978_v16  ;;  %p1058_p12 = scmp.lt.s32.totalorder %s1426_s10, %s1056_s15  ;;  %p1059_p13 = scmp.lt.s32.totalorder %s1057_s25, %s1051_s20 }
  0x7e   : > { %847 = vmatpush3.bf16.msra.mxu1 %v981_v15  ;;  %p1054_p10 = pneg %p1053_p8 }
  0x7f   : > { %848 = vmatprep.subr.bf16.mxu1 %v985_v19  ;;  %p1060_p3 = por %p1059_p13, %p1058_p12 }
  0x80   : > { %470 = vmatpush1.bf16.msra.mxu0 %v980_v17 }
  0x81   : > { %471 = vmatprep.subr.bf16.mxu0 %v982_v20  ;;  %p1061_p7 = pnand %p1060_p3, %p1054_p10 }
  0x82   : > { %849 = vmatpush3.bf16.msra.mxu1 %v985_v19 }
  0x83   : > { %850 = vmatprep.subr.bf16.mxu1 %v989_v22 }
  0x84   : > { %472 = vmatpush1.bf16.msra.mxu0 %v984_v21 }
  0x85   : > { %473 = vmatprep.subr.bf16.mxu0 %v986_v23 }
  0x86   : > { %851 = vmatpush3.bf16.msra.mxu1 %v989_v22 }
  0x87   : > { %852 = vmatprep.subr.bf16.mxu1 %v991_v25 }
  0x88   : > { %474 = vmatpush1.bf16.msra.mxu0 %v988_v24 }
  0x8a   : > { %853 = vmatpush3.bf16.msra.mxu1 %v991_v25 }
  0x8b   : > { %492 = vmatmul.mubr.bf16.vlgmr.msra.gmra.mrb[0].mxu0 %v990_v18 }
  0x8c   : > { %501 = vmatprep.mubr.bf16.mxu0 %v1193_v0 }
  0x8d   : > { %855 = vmatmul.mubr.bf16.vlgmr.msra.gmra.mrb[0].mxu1 %v992_v26 }
  0x93   : > { %502 = vmatmul.mubr.bf16.gmra.mrb[4].mxu0 %v992_v26 }
 0x15e   : > { %v493_v35 = vpop.f32.mrb[0].mxu0 }
 0x15f   : > { %v494_v37 = vadd.f32 %v493_v35, %v1412_v33  ;;  %v495_v38 = vpop.f32.mrb[1].mxu0 }
 0x160   : > { %v496_v39 = vadd.f32 %v495_v38, %v1414_v34  ;;  %v497_v40 = vpop.f32.mrb[2].mxu0  ;;  %v856_v43 = vpop.f32.mrb[0].mxu1 }
 0x161   : > { %v498_v41 = vadd.f32 %v497_v40, %v1412_v33  ;;  %v499_v42 = vpop.f32.mrb[3].mxu0  ;;  %v555_v46 = vadd.f32 %v856_v43, %v315_v36  ;;  %v546_v47 = vpop.f32.mrb[1].mxu1 }
 0x162   : > { %v823_v44 = vpack.c.bf16 %v496_v39, %v494_v37  ;;  %v500_v45 = vadd.f32 %v499_v42, %v1414_v34  ;;  %v547_v48 = vadd.f32 %v546_v47, %v315_v36  ;;  %v857_v49 = vpop.f32.mrb[2].mxu1 }
 0x163   : > { %591 = vst [vmem:[%s1420_s11 + $0x10] sm:$0xff] %v555_v46  ;;  %v558_v51 = vadd.f32 %v857_v49, %v315_v36  ;;  %v549_v52 = vpop.f32.mrb[3].mxu1 }
 0x164   : > { %585 = vst [vmem:[%s1430_s23] sm:$0xff] %v823_v44  ;;  %v824_v50 = vpack.c.bf16 %v500_v45, %v498_v41  ;;  %589 = vst [vmem:[%s1420_s11] sm:$0xff] %v547_v48  ;;  %v550_v53 = vadd.f32 %v549_v52, %v315_v36 }
 0x165   : > { %592 = vst [vmem:[%s1420_s11 + $0x18] sm:$0xff] %v558_v51 }
 0x166   : > { %586 = vst [vmem:[%s1430_s23 + $0x8] sm:$0xff] %v824_v50  ;;  %v503_v54 = vpop.f32.mrb[4].mxu0  ;;  %590 = vst [vmem:[%s1420_s11 + $0x8] sm:$0xff] %v550_v53 }
 0x167   : > { %v504_v55 = vadd.f32 %v503_v54, %v1412_v33  ;;  %v505_v56 = vpop.f32.mrb[5].mxu0 }
 0x168   : > { %v506_v57 = vadd.f32 %v505_v56, %v1414_v34  ;;  %v507_v58 = vpop.f32.mrb[6].mxu0 }
 0x169   : > { %1064 = shalt.err (!%p1061_p7)
}
 0x16a   : > { %s1065_s27 = scalar_lea.hbm %s1438_s19, 512  ;;  %s1069_s11 = scalar_lea.hbm %s1548_s4, 2048 }
 0x16b   : > { %p1066_p1 = scmp.ne.s32.totalorder %s1438_s19, %s1065_s27  ;;  %p1070_p5 = scmp.lt.u32.totalorder %s1438_s19, %s1548_s4 }
 0x16c   : > { %p1071_p9 = scmp.lt.u32.totalorder %s1069_s11, %s1065_s27  ;;  %p1073_p6 = scmp.lt.u32.totalorder %s1065_s27, %s1438_s19 }
 0x16d   : > { %p1067_p2 = pnand %p1066_p1, %p1328_p11 }
 0x16e   : > { %p1072_p0 = por %p1071_p9, %p1070_p5 }
 0x16f   : > { %p1068_p4 = pneg %p1067_p2 }
 0x170   : > { %p1074_p8 = por %p1073_p6, %p1072_p0 }
 0x172   : > { %p1075_p10 = pnand %p1074_p8, %p1068_p4 }
 0x174   : > { %1078 = shalt.err (!%p1075_p10)
}
 0x175   : > { %s1195_s12 = smov 128   ;;  %s1196_s14 = smov 8   ;;  %v508_v59 = vadd.f32 %v507_v58, %v1412_v33  ;;  %v509_v60 = vpop.f32.mrb[7].mxu0  ;;  %v825_v61 = vpack.c.bf16 %v506_v57, %v504_v55 }
 0x176   : > { %865 = dma.vmem_to_hbm [thread:$0]  (%p1328_p11), %s1426_s10, 512, %s1438_s19, %s599_s5, %s1195_s12, %s1195_s12, %s1196_s14   ;;  %v510_v62 = vadd.f32 %v509_v60, %v1414_v34 }
 0x177   : > { %s817_s24 = sshll.u32 %s1442_s26, 6  ;;  %587 = vst [vmem:[%s1430_s23 + $0x10] sm:$0xff] %v825_v61  ;;  %s594_s10 = scalar_lea.sflag [#allocation4], %s1393_s8 }
 0x178   : > { %v826_v63 = vpack.c.bf16 %v510_v62, %v508_v59  ;;  %s1486_s9 = scalar_lea.hbm %s1547_s3, %s817_s24  ;;  %s1079_s19 = scalar_lea.vmem %s1480_s30, 512 }
 0x179   : > { %p1080_p12 = scmp.ne.s32.totalorder %s1480_s30, %s1079_s19  ;;  %s1197_s26 = smov [#allocation7]  }
 0x17a   : > { %588 = vst [vmem:[%s1430_s23 + $0x18] sm:$0xff] %v826_v63  ;;  %s1083_s5 = sshll.u32 %s1197_s26, 4  ;;  %s1084_s5 = int_to_ptr.vmem [resolvable:$false] %s1083_s5 }
 0x17b   : > { %p1081_p13 = pnand %p1080_p12, %p1328_p11  ;;  %s1085_s15 = scalar_lea.vmem %s1084_s5, 1024 }
 0x17c   : > { %p1086_p7 = scmp.lt.s32.totalorder %s1480_s30, %s1084_s5  ;;  %p1087_p1 = scmp.lt.s32.totalorder %s1085_s15, %s1079_s19 }
 0x17d   : > { %p1082_p3 = pneg %p1081_p13 }
 0x17e   : > { %p1088_p2 = por %p1087_p1, %p1086_p7 }
 0x180   : > { %p1089_p4 = pnand %p1088_p2, %p1082_p3 }
 0x182   : > { %1092 = shalt.err (!%p1089_p4)
}
 0x183   : > { %s1093_s23 = scalar_lea.hbm %s1486_s9, 512  ;;  %s1097_s29 = scalar_lea.hbm %s1547_s3, 2048 }
 0x184   : > { %p1094_p5 = scmp.ne.s32.totalorder %s1486_s9, %s1093_s23  ;;  %p1098_p6 = scmp.lt.u32.totalorder %s1486_s9, %s1547_s3 }
 0x185   : > { %p1099_p8 = scmp.lt.u32.totalorder %s1097_s29, %s1093_s23  ;;  %p1101_p12 = scmp.lt.u32.totalorder %s1093_s23, %s1486_s9 }
 0x186   : > { %p1095_p9 = pnand %p1094_p5, %p1328_p11 }
 0x187   : > { %p1100_p10 = por %p1099_p8, %p1098_p6 }
 0x188   : > { %p1096_p0 = pneg %p1095_p9 }
 0x189   : > { %p1102_p13 = por %p1101_p12, %p1100_p10 }
 0x18b   : > { %p1103_p3 = pnand %p1102_p13, %p1096_p0 }
 0x18d   : > { %1106 = shalt.err (!%p1103_p3)
}
 0x18e   : > { %864 = dma.vmem_to_hbm [thread:$0]  (%p1328_p11), %s1480_s30, 512, %s1486_s9, %s594_s10, %s1195_s12, %s1195_s12, %s1196_s14  }
 0x18f PF: > { %s1578_s28 = sld [smem:[#allocation14_spill]]  ;;  %s1579_s13 = sld [smem:[#allocation16_spill]] }
 0x190   : > { %p886_p7 = scmp.ge.s32.totalorder %s1185_s22, 2 }
 0x195   : > { %s648_s24 = sand.u32 1, %s1578_s28   ;;  %p1580_p1 = scmp.ne.s32.totalorder %s1579_s13, 0 }
 0x196   : > { %s649_s18 = scalar_lea.sflag [#allocation4], %s648_s24 }
 0x197   : > { %p877_p2 = pnand %p886_p7, %p1580_p1 }
 0x199   : > { %1148 = dma.done.wait (!%p877_p2), %s649_s18, 512  }
 0x19a   : > { %1150 = vsyncadd (!%p877_p2), %s649_s18, 4294966784  ;;  %s658_s6 = scalar_lea.sflag [#allocation9], %s648_s24 }
 0x19b   : > { %1152 = dma.done.wait (!%p877_p2), %s658_s6, 512  }
 0x19c   : > { %1154 = vsyncadd (!%p877_p2), %s658_s6, 4294966784  ;;  %s25_s22 = sadd.s32 1, %s1185_s22   ;;  %s1581_s18 = sld [smem:[#allocation15_spill]] }
 0x19d   : > { %p22_p4 = scmp.ge.s32.totalorder %s25_s22, 6   ;;  %s1582_s20 = sld [smem:[#allocation17_spill]] }
 0x19e   : > { %s1583_s8 = sld [smem:[#allocation18_spill]]  ;;  %s1584_s15 = smov %s1161_s16 }
 0x19f   : > { %s1585_s16 = smov %s1165_s17  ;;  %s1586_s17 = smov %s1345_s1 }
 0x1a0   : > { %s1587_s19 = smov %s1181_s21  ;;  %24 = sbr.rel (!%p22_p4) target bundleno = 12 (0xc), region = 98 }
 0x1a4   : > { %s1588_s21 = smov %s1583_s8 }
 0x1a7   :  { %663 = vsyncpa [#allocation3], 1 }
 0x1a8   :  { %665 = vsyncpa [#allocation3 + $0x1], 1 }
 0x1a9   :  { %666 = vsyncpa [#allocation6], 1 }
 0x1aa   :  { %667 = vsyncpa [#allocation4], 1 }
 0x1ab   :  { %669 = vsyncpa [#allocation4 + $0x1], 1 }
 0x1ac   :  { %670 = vsyncpa [#allocation9], 1 }
 0x1ad   :  { %672 = vsyncpa [#allocation9 + $0x1], 1 }

</bundles_post_ra>
